<compile_context>
chip_gen: v5e
topology: v5e:2x2
jax: 0.10.0
libtpu: 0.0.40
codegen_flags: <defaults>
</compile_context>

<pallas_src>
import math
import jax
import jax.numpy as jnp
from jax.experimental import pallas as pl
from jax.experimental.pallas import tpu as pltpu


GATE_PAD = 128  # per-gate lane width (one full lane tile per gate)


def _encoder_kernel(src_ref, emb_ref, w_ref, b_ref, bn_ref, out_ref, hidden_ref):
    """Single-invocation GRU encoder (seq_len == 1, batch == 1, h0 == 0).

    Refs:
      src_ref    : (1,) SMEM            scalar-prefetched token id (index_map only)
      emb_ref    : (1, 1, GP) VMEM      selected embedding row, lane-padded to GP
      w_ref      : (L, GP, 3*GP) VMEM   fused per-layer input weights, per-gate
                                        lane-padded; rows >= in_dim are zero
      b_ref      : (L, 1, 3*GP) VMEM    folded biases [r | z | n_ih] per gate tile
      bn_ref     : (L, 1, GP) VMEM      b_hh_n (hidden-path bias of the n gate)
      out_ref    : (1, GP) VMEM         GRU `outputs` (top layer), lane-padded
      hidden_ref : (L, GP) VMEM         per-layer final hidden state, lane-padded
    """
    del src_ref  # only consumed by the BlockSpec index_map
    L = w_ref.shape[0]
    GP = w_ref.shape[1]

    x = emb_ref[0]                                            # (1, GP)
    hs = []
    h = None
    for l in range(L):                                        # unrolled at trace time
        # One fused matmul per layer; biases ride in a single lane-dense add.
        gi = jnp.dot(x, w_ref[l], preferred_element_type=jnp.float32) + b_ref[l]
        r = jax.nn.sigmoid(gi[:, 0:GP])                       # lane-tile aligned slices
        z = jax.nn.sigmoid(gi[:, GP:2 * GP])
        n = jnp.tanh(gi[:, 2 * GP:3 * GP] + r * bn_ref[l])
        # h_prev == 0  =>  z * h_prev == 0; padded lanes stay exactly 0.
        h = (1.0 - z) * n                                     # (1, GP)
        hs.append(h)
        x = h

    # Single-shot, lane-dense stores.
    hidden_ref[...] = jnp.concatenate(hs, axis=0)             # (L, GP)
    out_ref[...] = h                                          # (1, GP), last layer


def prepare_params(params, *, embbed_dim, hidden_dim, num_layers):
    """One-time packing of parameters for the kernel (hoisted out of forward)."""
    E, H, L = embbed_dim, hidden_dim, num_layers
    GP = GATE_PAD
    assert E <= GP and H <= GP, "this packing assumes embed/hidden dims <= 128"

    w_all = jnp.zeros((L, GP, 3 * GP), jnp.float32)   # fused, per-gate lane-padded
    b_all = jnp.zeros((L, 1, 3 * GP), jnp.float32)    # [r | z | n_ih] folded biases
    bn_all = jnp.zeros((L, 1, GP), jnp.float32)       # b_hh_n
    for l in range(L):
        w_ih = params[f"w_ih_l{l}"].astype(jnp.float32)       # (3H, in_dim), gates r,z,n
        b_ih = params[f"b_ih_l{l}"].astype(jnp.float32)       # (3H,)
        b_hh = params[f"b_hh_l{l}"].astype(jnp.float32)       # (3H,)
        in_dim = w_ih.shape[1]
        for g in range(3):                                    # r, z, n
            w_g = w_ih[g * H:(g + 1) * H, :].T                # (in_dim, H)
            w_all = w_all.at[l, :in_dim, g * GP:g * GP + H].set(w_g)
        b_all = b_all.at[l, 0, 0 * GP:0 * GP + H].set(b_ih[0:H] + b_hh[0:H])          # r
        b_all = b_all.at[l, 0, 1 * GP:1 * GP + H].set(b_ih[H:2 * H] + b_hh[H:2 * H])  # z
        b_all = b_all.at[l, 0, 2 * GP:2 * GP + H].set(b_ih[2 * H:3 * H])              # n (ih)
        bn_all = bn_all.at[l, 0, :H].set(b_hh[2 * H:3 * H])                           # n (hh)

    # Embedding table lane-padded to GP so the gathered row is directly the
    # layer-0 input (no concatenate / padding on the kernel's critical path).
    emb = params["embedding"].astype(jnp.float32)             # (vocab, E)
    vocab = emb.shape[0]
    emb_pad = jnp.zeros((vocab, 1, GP), jnp.float32).at[:, 0, :E].set(emb)
    return {"emb": emb_pad, "w": w_all, "b": b_all, "bn": bn_all}


def encoder_forward(src, packed, *, hidden_dim, num_layers):
    """Pallas equivalent of Encoder.forward. `src` is a scalar int32 token id."""
    H, L = hidden_dim, num_layers
    emb, w_all, b_all, bn_all = packed["emb"], packed["w"], packed["b"], packed["bn"]
    GP = w_all.shape[1]
    GP3 = w_all.shape[2]

    src_idx = jnp.asarray(src, jnp.int32).reshape(1)          # scalar-prefetch operand

    grid_spec = pltpu.PrefetchScalarGridSpec(
        num_scalar_prefetch=1,
        grid=(1,),
        in_specs=[
            # Embedding row selected by the prefetched token id (fused gather).
            pl.BlockSpec((1, 1, GP), lambda i, s: (s[0], 0, 0)),
            # All layer weights / biases resident in VMEM (~0.4 MiB total).
            pl.BlockSpec((L, GP, GP3), lambda i, s: (0, 0, 0)),
            pl.BlockSpec((L, 1, GP3), lambda i, s: (0, 0, 0)),
            pl.BlockSpec((L, 1, GP), lambda i, s: (0, 0, 0)),
        ],
        out_specs=[
            pl.BlockSpec((1, GP), lambda i, s: (0, 0)),       # outputs (lane-padded)
            pl.BlockSpec((L, GP), lambda i, s: (0, 0)),       # hidden  (lane-padded)
        ],
    )

    out_p, hid_p = pl.pallas_call(
        _encoder_kernel,
        out_shape=(
            jax.ShapeDtypeStruct((1, GP), jnp.float32),
            jax.ShapeDtypeStruct((L, GP), jnp.float32),
        ),
        grid_spec=grid_spec,
        compiler_params=pltpu.CompilerParams(
            dimension_semantics=("arbitrary",)),
    )(src_idx, emb, w_all, b_all, bn_all)

    # Kernel outputs are lane-dense (width 128, unmasked stores); trim to H and
    # restore the module's (seq, batch, H) / (layers, batch, H) shapes here.
    outputs = out_p[:, :H].reshape(1, 1, H)
    hidden = hid_p[:, :H].reshape(L, 1, H)
    return outputs, hidden


# ---------------- pure-JAX reference (full GRU cell, for correctness check) ----------------
def _gru_cell_ref(x, h, w_ih, w_hh, b_ih, b_hh):
    H = h.shape[-1]
    gi = x @ w_ih.T + b_ih
    gh = h @ w_hh.T + b_hh
    r = jax.nn.sigmoid(gi[..., :H] + gh[..., :H])
    z = jax.nn.sigmoid(gi[..., H:2 * H] + gh[..., H:2 * H])
    n = jnp.tanh(gi[..., 2 * H:] + r * gh[..., 2 * H:])
    return (1.0 - z) * n + z * h


def encoder_forward_ref(src, params, *, embbed_dim, hidden_dim, num_layers):
    embedded = params["embedding"][src].reshape(1, 1, -1)
    x = embedded.reshape(1, embbed_dim)
    hiddens = []
    for layer in range(num_layers):
        h0 = jnp.zeros((1, hidden_dim), jnp.float32)
        h = _gru_cell_ref(x, h0,
                          params[f"w_ih_l{layer}"], params[f"w_hh_l{layer}"],
                          params[f"b_ih_l{layer}"], params[f"b_hh_l{layer}"])
        hiddens.append(h)
        x = h
    outputs = x.reshape(1, 1, hidden_dim)
    hidden = jnp.stack(hiddens, axis=0)
    return outputs, hidden


# ---------------- deterministic parameter init ----------------
def init_params(key, input_dim, embbed_dim, hidden_dim, num_layers):
    params = {}
    k_emb, key = jax.random.split(key)
    params["embedding"] = jax.random.normal(k_emb, (input_dim, embbed_dim), jnp.float32)
    bound = 1.0 / math.sqrt(hidden_dim)
    for layer in range(num_layers):
        in_dim = embbed_dim if layer == 0 else hidden_dim
        key, k1, k2, k3, k4 = jax.random.split(key, 5)
        params[f"w_ih_l{layer}"] = jax.random.uniform(
            k1, (3 * hidden_dim, in_dim), jnp.float32, -bound, bound)
        params[f"w_hh_l{layer}"] = jax.random.uniform(
            k2, (3 * hidden_dim, hidden_dim), jnp.float32, -bound, bound)
        params[f"b_ih_l{layer}"] = jax.random.uniform(
            k3, (3 * hidden_dim,), jnp.float32, -bound, bound)
        params[f"b_hh_l{layer}"] = jax.random.uniform(
            k4, (3 * hidden_dim,), jnp.float32, -bound, bound)
    return params


if __name__ == "__main__":
    INPUT_DIM = 50      # vocab size (len(SRC.vocab) analogue)
    EMBED_DIM = 32
    HIDDEN_DIM = 32
    NUM_LAYERS = 2

    key = jax.random.PRNGKey(0)
    params = init_params(key, INPUT_DIM, EMBED_DIM, HIDDEN_DIM, NUM_LAYERS)

    # One-time weight packing (per parameter set, not per forward call).
    packed = prepare_params(params, embbed_dim=EMBED_DIM,
                            hidden_dim=HIDDEN_DIM, num_layers=NUM_LAYERS)

    # A single source token id, as the reference forward expects (view(1,1,-1)).
    src = jnp.array(7, dtype=jnp.int32)

    outputs, hidden = encoder_forward(
        src, packed, hidden_dim=HIDDEN_DIM, num_layers=NUM_LAYERS)
    jax.block_until_ready((outputs, hidden))

    ref_outputs, ref_hidden = encoder_forward_ref(
        src, params, embbed_dim=EMBED_DIM, hidden_dim=HIDDEN_DIM, num_layers=NUM_LAYERS)

    assert outputs.shape == (1, 1, HIDDEN_DIM)
    assert hidden.shape == (NUM_LAYERS, 1, HIDDEN_DIM)
    assert jnp.allclose(outputs, ref_outputs, atol=1e-5, rtol=1e-5)
    assert jnp.allclose(hidden, ref_hidden, atol=1e-5, rtol=1e-5)

    print("KERNEL_OK")
</pallas_src>

<mosaic_0001>
module attributes {stable_mosaic.version = 11 : i64} {
  func.func @_encoder_kernel(%arg0: i32, %arg1: memref<1xi32, #tpu.memory_space<smem>>, %arg2: memref<1x1x128xf32, #tpu.memory_space<vmem>>, %arg3: memref<2x128x384xf32, #tpu.memory_space<vmem>>, %arg4: memref<2x1x384xf32, #tpu.memory_space<vmem>>, %arg5: memref<2x1x128xf32, #tpu.memory_space<vmem>>, %arg6: memref<1x128xf32, #tpu.memory_space<vmem>>, %arg7: memref<2x128xf32, #tpu.memory_space<vmem>>) attributes {dimension_semantics = [#tpu.dimension_semantics<arbitrary>], iteration_bounds = array<i64: 1>, scalar_prefetch = 1 : i64, scratch_operands = 0 : i64, tpu.core_type = #tpu.core_type<tc>, window_params = [{transform_indices = @transform_0, window_bounds = array<i64: 1, 1, 128>}, {pipeline_mode = #tpu.pipeline_mode<synchronous>, transform_indices = @transform_1, window_bounds = array<i64: 2, 128, 384>}, {pipeline_mode = #tpu.pipeline_mode<synchronous>, transform_indices = @transform_2, window_bounds = array<i64: 2, 1, 384>}, {pipeline_mode = #tpu.pipeline_mode<synchronous>, transform_indices = @transform_3, window_bounds = array<i64: 2, 1, 128>}, {pipeline_mode = #tpu.pipeline_mode<synchronous>, transform_indices = @transform_4, window_bounds = array<i64: 1, 128>}, {pipeline_mode = #tpu.pipeline_mode<synchronous>, transform_indices = @transform_5, window_bounds = array<i64: 2, 128>}]} {
    %c0 = arith.constant 0 : index
    %c0_0 = arith.constant 0 : index
    %c0_1 = arith.constant 0 : index
    %0 = vector.load %arg2[%c0, %c0_0, %c0_1] : memref<1x1x128xf32, #tpu.memory_space<vmem>>, vector<1x1x128xf32>
    %1 = vector.shape_cast %0 : vector<1x1x128xf32> to vector<1x128xf32>
    %c0_2 = arith.constant 0 : index
    %c0_3 = arith.constant 0 : index
    %c0_4 = arith.constant 0 : index
    %2 = vector.load %arg3[%c0_2, %c0_3, %c0_4] : memref<2x128x384xf32, #tpu.memory_space<vmem>>, vector<1x128x384xf32>
    %3 = vector.shape_cast %2 : vector<1x128x384xf32> to vector<128x384xf32>
    %cst = arith.constant dense<0.000000e+00> : vector<1x384xf32>
    %4 = tpu.matmul %1, %3, %cst {dimension_numbers = #tpu.dot_dimension_numbers<[1], [0], [0], [1], [0, 0, 1, 1], [], []>} : vector<1x128xf32>, vector<128x384xf32>, vector<1x384xf32> -> vector<1x384xf32>
    %c0_5 = arith.constant 0 : index
    %c0_6 = arith.constant 0 : index
    %c0_7 = arith.constant 0 : index
    %5 = vector.load %arg4[%c0_5, %c0_6, %c0_7] : memref<2x1x384xf32, #tpu.memory_space<vmem>>, vector<1x1x384xf32>
    %6 = vector.shape_cast %5 : vector<1x1x384xf32> to vector<1x384xf32>
    %7 = arith.addf %4, %6 : vector<1x384xf32>
    %8 = vector.extract_strided_slice %7 {offsets = [0, 0], sizes = [1, 128], strides = [1, 1]} : vector<1x384xf32> to vector<1x128xf32>
    %9 = arith.negf %8 : vector<1x128xf32>
    %10 = math.exp %9 : vector<1x128xf32>
    %cst_8 = arith.constant 1.000000e+00 : f32
    %11 = vector.broadcast %cst_8 : f32 to vector<1x128xf32>
    %12 = arith.addf %11, %10 : vector<1x128xf32>
    %13 = arith.divf %11, %12 : vector<1x128xf32>
    %14 = vector.extract_strided_slice %7 {offsets = [0, 128], sizes = [1, 128], strides = [1, 1]} : vector<1x384xf32> to vector<1x128xf32>
    %15 = arith.negf %14 : vector<1x128xf32>
    %16 = math.exp %15 : vector<1x128xf32>
    %cst_9 = arith.constant 1.000000e+00 : f32
    %17 = vector.broadcast %cst_9 : f32 to vector<1x128xf32>
    %18 = arith.addf %17, %16 : vector<1x128xf32>
    %19 = arith.divf %17, %18 : vector<1x128xf32>
    %20 = vector.extract_strided_slice %7 {offsets = [0, 256], sizes = [1, 128], strides = [1, 1]} : vector<1x384xf32> to vector<1x128xf32>
    %c0_10 = arith.constant 0 : index
    %c0_11 = arith.constant 0 : index
    %c0_12 = arith.constant 0 : index
    %21 = vector.load %arg5[%c0_10, %c0_11, %c0_12] : memref<2x1x128xf32, #tpu.memory_space<vmem>>, vector<1x1x128xf32>
    %22 = vector.shape_cast %21 : vector<1x1x128xf32> to vector<1x128xf32>
    %23 = arith.mulf %13, %22 : vector<1x128xf32>
    %24 = arith.addf %20, %23 : vector<1x128xf32>
    %25 = math.tanh %24 : vector<1x128xf32>
    %cst_13 = arith.constant 1.000000e+00 : f32
    %26 = vector.broadcast %cst_13 : f32 to vector<1x128xf32>
    %27 = arith.subf %26, %19 : vector<1x128xf32>
    %28 = arith.mulf %27, %25 : vector<1x128xf32>
    %c1 = arith.constant 1 : index
    %c0_14 = arith.constant 0 : index
    %c0_15 = arith.constant 0 : index
    %29 = vector.load %arg3[%c1, %c0_14, %c0_15] : memref<2x128x384xf32, #tpu.memory_space<vmem>>, vector<1x128x384xf32>
    %30 = vector.shape_cast %29 : vector<1x128x384xf32> to vector<128x384xf32>
    %cst_16 = arith.constant dense<0.000000e+00> : vector<1x384xf32>
    %31 = tpu.matmul %28, %30, %cst_16 {dimension_numbers = #tpu.dot_dimension_numbers<[1], [0], [0], [1], [0, 0, 1, 1], [], []>} : vector<1x128xf32>, vector<128x384xf32>, vector<1x384xf32> -> vector<1x384xf32>
    %c1_17 = arith.constant 1 : index
    %c0_18 = arith.constant 0 : index
    %c0_19 = arith.constant 0 : index
    %32 = vector.load %arg4[%c1_17, %c0_18, %c0_19] : memref<2x1x384xf32, #tpu.memory_space<vmem>>, vector<1x1x384xf32>
    %33 = vector.shape_cast %32 : vector<1x1x384xf32> to vector<1x384xf32>
    %34 = arith.addf %31, %33 : vector<1x384xf32>
    %35 = vector.extract_strided_slice %34 {offsets = [0, 0], sizes = [1, 128], strides = [1, 1]} : vector<1x384xf32> to vector<1x128xf32>
    %36 = arith.negf %35 : vector<1x128xf32>
    %37 = math.exp %36 : vector<1x128xf32>
    %cst_20 = arith.constant 1.000000e+00 : f32
    %38 = vector.broadcast %cst_20 : f32 to vector<1x128xf32>
    %39 = arith.addf %38, %37 : vector<1x128xf32>
    %40 = arith.divf %38, %39 : vector<1x128xf32>
    %41 = vector.extract_strided_slice %34 {offsets = [0, 128], sizes = [1, 128], strides = [1, 1]} : vector<1x384xf32> to vector<1x128xf32>
    %42 = arith.negf %41 : vector<1x128xf32>
    %43 = math.exp %42 : vector<1x128xf32>
    %cst_21 = arith.constant 1.000000e+00 : f32
    %44 = vector.broadcast %cst_21 : f32 to vector<1x128xf32>
    %45 = arith.addf %44, %43 : vector<1x128xf32>
    %46 = arith.divf %44, %45 : vector<1x128xf32>
    %47 = vector.extract_strided_slice %34 {offsets = [0, 256], sizes = [1, 128], strides = [1, 1]} : vector<1x384xf32> to vector<1x128xf32>
    %c1_22 = arith.constant 1 : index
    %c0_23 = arith.constant 0 : index
    %c0_24 = arith.constant 0 : index
    %48 = vector.load %arg5[%c1_22, %c0_23, %c0_24] : memref<2x1x128xf32, #tpu.memory_space<vmem>>, vector<1x1x128xf32>
    %49 = vector.shape_cast %48 : vector<1x1x128xf32> to vector<1x128xf32>
    %50 = arith.mulf %40, %49 : vector<1x128xf32>
    %51 = arith.addf %47, %50 : vector<1x128xf32>
    %52 = math.tanh %51 : vector<1x128xf32>
    %cst_25 = arith.constant 1.000000e+00 : f32
    %53 = vector.broadcast %cst_25 : f32 to vector<1x128xf32>
    %54 = arith.subf %53, %46 : vector<1x128xf32>
    %55 = arith.mulf %54, %52 : vector<1x128xf32>
    %56 = tpu.concatenate %28, %55 in 0 : vector<1x128xf32>, vector<1x128xf32> -> vector<2x128xf32>
    %c0_26 = arith.constant 0 : index
    %c0_27 = arith.constant 0 : index
    %57 = vector.load %arg7[%c0_26, %c0_27] : memref<2x128xf32, #tpu.memory_space<vmem>>, vector<2x128xf32>
    tpu.vector_store %arg7[%c0_26, %c0_27], %56 {strides = array<i32>} : memref<2x128xf32, #tpu.memory_space<vmem>>, vector<2x128xf32>,
    %c0_28 = arith.constant 0 : index
    %c0_29 = arith.constant 0 : index
    %58 = vector.load %arg6[%c0_28, %c0_29] : memref<1x128xf32, #tpu.memory_space<vmem>>, vector<1x128xf32>
    tpu.vector_store %arg6[%c0_28, %c0_29], %55 {strides = array<i32>} : memref<1x128xf32, #tpu.memory_space<vmem>>, vector<1x128xf32>,
    return
  }
  func.func @transform_0(%arg0: i32, %arg1: memref<1xi32, #tpu.memory_space<smem>>) -> (i32, i32, i32) {
    %c0 = arith.constant 0 : index
    %0 = memref.load %arg1[%c0] : memref<1xi32, #tpu.memory_space<smem>>
    %c0_i32 = arith.constant 0 : i32
    %c0_i32_0 = arith.constant 0 : i32
    %c0_i32_1 = arith.constant 0 : i32
    return %0, %c0_i32, %c0_i32_0 : i32, i32, i32
  }
  func.func @transform_1(%arg0: i32, %arg1: memref<1xi32, #tpu.memory_space<smem>>) -> (i32, i32, i32) {
    %c0_i32 = arith.constant 0 : i32
    %c0_i32_0 = arith.constant 0 : i32
    %c0_i32_1 = arith.constant 0 : i32
    %c0_i32_2 = arith.constant 0 : i32
    return %c0_i32, %c0_i32_0, %c0_i32_1 : i32, i32, i32
  }
  func.func @transform_2(%arg0: i32, %arg1: memref<1xi32, #tpu.memory_space<smem>>) -> (i32, i32, i32) {
    %c0_i32 = arith.constant 0 : i32
    %c0_i32_0 = arith.constant 0 : i32
    %c0_i32_1 = arith.constant 0 : i32
    %c0_i32_2 = arith.constant 0 : i32
    return %c0_i32, %c0_i32_0, %c0_i32_1 : i32, i32, i32
  }
  func.func @transform_3(%arg0: i32, %arg1: memref<1xi32, #tpu.memory_space<smem>>) -> (i32, i32, i32) {
    %c0_i32 = arith.constant 0 : i32
    %c0_i32_0 = arith.constant 0 : i32
    %c0_i32_1 = arith.constant 0 : i32
    %c0_i32_2 = arith.constant 0 : i32
    return %c0_i32, %c0_i32_0, %c0_i32_1 : i32, i32, i32
  }
  func.func @transform_4(%arg0: i32, %arg1: memref<1xi32, #tpu.memory_space<smem>>) -> (i32, i32) {
    %c0_i32 = arith.constant 0 : i32
    %c0_i32_0 = arith.constant 0 : i32
    %c0_i32_1 = arith.constant 0 : i32
    return %c0_i32, %c0_i32_0 : i32, i32
  }
  func.func @transform_5(%arg0: i32, %arg1: memref<1xi32, #tpu.memory_space<smem>>) -> (i32, i32) {
    %c0_i32 = arith.constant 0 : i32
    %c0_i32_0 = arith.constant 0 : i32
    %c0_i32_1 = arith.constant 0 : i32
    return %c0_i32, %c0_i32_0 : i32, i32
  }
}

</mosaic_0001>

<bundles_post_ra>
// kernel: tpu_custom_call.1
= control target key start
LH: loop header
LB: loop body
LE: loop exit
PB: predicated region body
PF: predicated region fallthrough
CT: control target
= control target key end

     0   :  { %13 = vsyncpa [#allocation5], 0  ;;  %s684_s0 = inlined_call_operand.<no memory space> [shape: s32[1], index: 0, kind: input, shape index: {}]   ;;  %s685_s1 = inlined_call_operand.hbm [shape: f32[50,1,128], index: 1, kind: input, shape index: {}]   ;;  %s686_s2 = inlined_call_operand.hbm [shape: f32[2,128,384], index: 2, kind: input, shape index: {}]   ;;  %s687_s3 = inlined_call_operand.hbm [shape: f32[2,1,384], index: 3, kind: input, shape index: {}]   ;;  %s688_s4 = inlined_call_operand.vmem [shape: f32[2,1,128], index: 4, kind: input, shape index: {}]   ;;  %s689_s5 = inlined_call_operand.hbm [shape: f32[1,128], index: 5, kind: output, shape index: {0}]   ;;  %s690_s6 = inlined_call_operand.hbm [shape: f32[2,128], index: 6, kind: output, shape index: {1}]  }
   0x1   :  { %14 = vsyncpa [#allocation8], 0 }
   0x2   :  { %15 = vsyncpa [#allocation6], 0  ;;  %s34_s23 = sshll.u32 %s686_s2, 4  ;;  %s35_s23 = int_to_ptr.hbm [resolvable:$true] %s34_s23 }
   0x3   :  { %16 = vsyncpa [#allocation12], 0  ;;  %s599_s24 = smov [#allocation7]   ;;  %s22_s30 = scalar_lea.hbm %s685_s1, %s684_s0 }
   0x4   :  { %s36_s25 = sshll.u32 %s599_s24, 4  ;;  %s600_s7 = smov 384   ;;  %s37_s25 = int_to_ptr.vmem [resolvable:$true] %s36_s25 }
   0x5   :  { %s601_s8 = smov 24   ;;  %s24_s9 = sshll.u32 %s22_s30, 4  ;;  %s25_s9 = int_to_ptr.hbm [resolvable:$true] %s24_s9 }
   0x6   :  { %42 = dma.hbm_to_vmem [thread:$0]  %s35_s23, 12288, %s37_s25, [#allocation8], %s600_s7, %s600_s7, %s601_s8  }
   0x7   :  { %s602_s10 = smov [#allocation4]   ;;  %s47_s13 = sshll.u32 %s687_s3, 4  ;;  %s48_s13 = int_to_ptr.hbm [resolvable:$true] %s47_s13 }
   0x8   :  { %s26_s11 = sshll.u32 %s602_s10, 4  ;;  %s495_s14 = sshra.s32 %s25_s9, 4  ;;  %s27_s11 = int_to_ptr.vmem [resolvable:$true] %s26_s11  ;;  %s496_s14 = int_to_ptr.hbm [resolvable:$true] %s495_s14 }
   0x9   :  { %s497_s15 = scalar_lea.hbm %s496_s14, 1  ;;  %s499_s0 = scalar_lea.hbm %s685_s1, 50 }
   0xa   :  { %p498_p0 = scmp.ne.s32.totalorder %s496_s14, %s497_s15  ;;  %p500_p1 = scmp.lt.s32.totalorder %s496_s14, %s685_s1 }
   0xb   :  { %p501_p2 = scmp.lt.s32.totalorder %s499_s0, %s497_s15 }
   0xd   :  { %p502_p3 = por %p501_p2, %p500_p1 }
   0xf   :  { %p503_p4 = pnand %p502_p3, %p498_p0 }
  0x11   :  { %506 = shalt.err (!%p503_p4)
}
  0x12   :  { %29 = dma.hbm_to_vmem [thread:$0]  %s25_s9, 16, %s27_s11, [#allocation5]  }
  0x13   :  { %s603_s20 = smov [#allocation9]   ;;  %s604_s21 = smov 48  }
  0x14   :  { %s49_s3 = sshll.u32 %s603_s20, 4  ;;  %s605_s22 = smov 3   ;;  %s50_s3 = int_to_ptr.vmem [resolvable:$true] %s49_s3 }
  0x15   :  { %55 = dma.hbm_to_vmem [thread:$0]  %s48_s13, 96, %s50_s3, [#allocation8], %s604_s21, %s604_s21, %s605_s22  }
  0x16   :  { %591 = dma.done.wait [#allocation5], 16  }
  0x17   :  { %592 = vsyncadd [#allocation5], 4294967280 }
  0x18   :  { %593 = dma.done.wait [#allocation8], 12384  }
  0x19   :  { %594 = vsyncadd [#allocation8], 4294954912  ;;  %v117_v0 = vld [vmem:[#allocation7 + $0x168] sm:$0xff]  ;;  %v118_v1 = vld [vmem:[#allocation7 + $0x170] sm:$0xff]  ;;  %s606_s26 = smov [#allocation10]   ;;  %s409_s29 = sshll.u32 %s689_s5, 4  ;;  %s410_s29 = int_to_ptr.hbm [resolvable:$true] %s409_s29 }
  0x1a   :  { %v114_v2 = vld [vmem:[#allocation7 + $0x150] sm:$0xff]  ;;  %128 = vmatpush.msra.mxu0 %v117_v0  ;;  %148 = vmatpush.msra.mxu1 %v118_v1  ;;  %v115_v3 = vld [vmem:[#allocation7 + $0x158] sm:$0xff]  ;;  %v112_v5 = vld [vmem:[#allocation7 + $0x140] sm:$0xff]  ;;  %s407_s27 = sshll.u32 %s606_s26, 4  ;;  %s607_s30 = smov [#allocation11]   ;;  %s408_s27 = int_to_ptr.vmem [resolvable:$true] %s407_s27 }
  0x1b   :  { %v111_v4 = vld [vmem:[#allocation7 + $0x138] sm:$0xff]  ;;  %v108_v6 = vld [vmem:[#allocation7 + $0x120] sm:$0xff]  ;;  %v109_v7 = vld [vmem:[#allocation7 + $0x128] sm:$0xff]  ;;  %s418_s7 = sshll.u32 %s607_s30, 4  ;;  %s420_s10 = sshll.u32 %s690_s6, 4  ;;  %s419_s7 = int_to_ptr.vmem [resolvable:$true] %s418_s7  ;;  %s421_s10 = int_to_ptr.hbm [resolvable:$true] %s420_s10 }
  0x1c   :  { %129 = vmatpush.msra.mxu0 %v114_v2  ;;  %149 = vmatpush.msra.mxu1 %v115_v3  ;;  %v105_v8 = vld [vmem:[#allocation7 + $0x108] sm:$0xff]  ;;  %v106_v9 = vld [vmem:[#allocation7 + $0x110] sm:$0xff]  ;;  %v103_v11 = vld [vmem:[#allocation7 + $0xf8] sm:$0xff] }
  0x1d   :  { %v102_v10 = vld [vmem:[#allocation7 + $0xf0] sm:$0xff]  ;;  %v119_v12 = vld [vmem:[#allocation7 + $0x178] sm:$0xff]  ;;  %v116_v13 = vld [vmem:[#allocation7 + $0x160] sm:$0xff] }
  0x1e   :  { %130 = vmatpush.msra.mxu0 %v111_v4  ;;  %150 = vmatpush.msra.mxu1 %v112_v5  ;;  %v99_v14 = vld [vmem:[#allocation7 + $0xd8] sm:$0xff]  ;;  %v100_v15 = vld [vmem:[#allocation7 + $0xe0] sm:$0xff]  ;;  %v113_v16 = vld [vmem:[#allocation7 + $0x148] sm:$0xff] }
  0x1f   :  { %168 = vmatpush.msra.mxu2 %v119_v12  ;;  %v96_v17 = vld [vmem:[#allocation7 + $0xc0] sm:$0xff]  ;;  %v97_v18 = vld [vmem:[#allocation7 + $0xc8] sm:$0xff]  ;;  %v110_v19 = vld [vmem:[#allocation7 + $0x130] sm:$0xff] }
  0x20   :  { %131 = vmatpush.msra.mxu0 %v108_v6  ;;  %151 = vmatpush.msra.mxu1 %v109_v7  ;;  %v93_v20 = vld [vmem:[#allocation7 + $0xa8] sm:$0xff]  ;;  %v94_v21 = vld [vmem:[#allocation7 + $0xb0] sm:$0xff]  ;;  %v107_v22 = vld [vmem:[#allocation7 + $0x118] sm:$0xff] }
  0x21   :  { %169 = vmatpush.msra.mxu2 %v116_v13  ;;  %v90_v23 = vld [vmem:[#allocation7 + $0x90] sm:$0xff]  ;;  %v91_v24 = vld [vmem:[#allocation7 + $0x98] sm:$0xff]  ;;  %v104_v25 = vld [vmem:[#allocation7 + $0x100] sm:$0xff] }
  0x22   :  { %132 = vmatpush.msra.mxu0 %v105_v8  ;;  %152 = vmatpush.msra.mxu1 %v106_v9  ;;  %v87_v26 = vld [vmem:[#allocation7 + $0x78] sm:$0xff]  ;;  %v88_v27 = vld [vmem:[#allocation7 + $0x80] sm:$0xff]  ;;  %v101_v28 = vld [vmem:[#allocation7 + $0xe8] sm:$0xff] }
  0x23   :  { %170 = vmatpush.msra.mxu2 %v113_v16  ;;  %v84_v29 = vld [vmem:[#allocation7 + $0x60] sm:$0xff]  ;;  %v85_v30 = vld [vmem:[#allocation7 + $0x68] sm:$0xff]  ;;  %v98_v31 = vld [vmem:[#allocation7 + $0xd0] sm:$0xff] }
  0x24   :  { %133 = vmatpush.msra.mxu0 %v102_v10  ;;  %153 = vmatpush.msra.mxu1 %v103_v11  ;;  %v81_v32 = vld [vmem:[#allocation7 + $0x48] sm:$0xff]  ;;  %v82_v33 = vld [vmem:[#allocation7 + $0x50] sm:$0xff]  ;;  %v95_v34 = vld [vmem:[#allocation7 + $0xb8] sm:$0xff] }
  0x25   :  { %171 = vmatpush.msra.mxu2 %v110_v19  ;;  %v78_v35 = vld [vmem:[#allocation7 + $0x30] sm:$0xff]  ;;  %v79_v36 = vld [vmem:[#allocation7 + $0x38] sm:$0xff]  ;;  %v92_v37 = vld [vmem:[#allocation7 + $0xa0] sm:$0xff] }
  0x26   :  { %134 = vmatpush.msra.mxu0 %v99_v14  ;;  %154 = vmatpush.msra.mxu1 %v100_v15  ;;  %v75_v38 = vld [vmem:[#allocation7 + $0x18] sm:$0xff]  ;;  %v76_v39 = vld [vmem:[#allocation7 + $0x20] sm:$0xff]  ;;  %v89_v40 = vld [vmem:[#allocation7 + $0x88] sm:$0xff] }
  0x27   :  { %172 = vmatpush.msra.mxu2 %v107_v22  ;;  %v72_v41 = vld [vmem:[#allocation7] sm:$0xff]  ;;  %v73_v42 = vld [vmem:[#allocation7 + $0x8] sm:$0xff]  ;;  %v71_v43 = vld [vmem:[#allocation4] sm:$0x1] }
  0x28   :  { %135 = vmatpush.msra.mxu0 %v96_v17  ;;  %155 = vmatpush.msra.mxu1 %v97_v18  ;;  %v86_v44 = vld [vmem:[#allocation7 + $0x70] sm:$0xff]  ;;  %v83_v45 = vld [vmem:[#allocation7 + $0x58] sm:$0xff]  ;;  %v80_v46 = vld [vmem:[#allocation7 + $0x40] sm:$0xff] }
  0x29   :  { %173 = vmatpush.msra.mxu2 %v104_v25  ;;  %v77_v47 = vld [vmem:[#allocation7 + $0x28] sm:$0xff]  ;;  %v74_v48 = vld [vmem:[#allocation7 + $0x10] sm:$0xff]  ;;  %v280_v51 = vld [vmem:[#allocation7 + $0x2f8] sm:$0xff] }
  0x2a   :  { %136 = vmatpush.msra.mxu0 %v93_v20  ;;  %156 = vmatpush.msra.mxu1 %v94_v21  ;;  %v278_v49 = vld [vmem:[#allocation7 + $0x2e8] sm:$0xff]  ;;  %v279_v50 = vld [vmem:[#allocation7 + $0x2f0] sm:$0xff]  ;;  %v276_v53 = vld [vmem:[#allocation7 + $0x2d8] sm:$0xff] }
  0x2b   :  { %174 = vmatpush.msra.mxu2 %v101_v28  ;;  %290 = vmatpush.msra.mxu3 %v278_v49  ;;  %v275_v52 = vld [vmem:[#allocation7 + $0x2d0] sm:$0xff]  ;;  %v277_v54 = vld [vmem:[#allocation7 + $0x2e0] sm:$0xff]  ;;  %v272_v55 = vld [vmem:[#allocation7 + $0x2b8] sm:$0xff] }
  0x2c   :  { %137 = vmatpush.msra.mxu0 %v90_v23  ;;  %157 = vmatpush.msra.mxu1 %v91_v24  ;;  %v273_v56 = vld [vmem:[#allocation7 + $0x2c0] sm:$0xff]  ;;  %v274_v57 = vld [vmem:[#allocation7 + $0x2c8] sm:$0xff]  ;;  %v271_v60 = vld [vmem:[#allocation7 + $0x2b0] sm:$0xff] }
  0x2d   :  { %175 = vmatpush.msra.mxu2 %v98_v31  ;;  %291 = vmatpush.msra.mxu3 %v275_v52  ;;  %v269_v58 = vld [vmem:[#allocation7 + $0x2a0] sm:$0xff]  ;;  %v270_v59 = vld [vmem:[#allocation7 + $0x2a8] sm:$0xff]  ;;  %v267_v62 = vld [vmem:[#allocation7 + $0x290] sm:$0xff] }
  0x2e   :  { %138 = vmatpush.msra.mxu0 %v87_v26  ;;  %158 = vmatpush.msra.mxu1 %v88_v27  ;;  %v266_v61 = vld [vmem:[#allocation7 + $0x288] sm:$0xff]  ;;  %v268_v63 = vld [vmem:[#allocation7 + $0x298] sm:$0xff]  ;;  %v263_v0 = vld [vmem:[#allocation7 + $0x270] sm:$0xff] }
  0x2f   :  { %176 = vmatpush.msra.mxu2 %v95_v34  ;;  %292 = vmatpush.msra.mxu3 %v272_v55  ;;  %v264_v1 = vld [vmem:[#allocation7 + $0x278] sm:$0xff]  ;;  %v265_v2 = vld [vmem:[#allocation7 + $0x280] sm:$0xff]  ;;  %v262_v6 = vld [vmem:[#allocation7 + $0x268] sm:$0xff] }
  0x30   :  { %139 = vmatpush.msra.mxu0 %v84_v29  ;;  %159 = vmatpush.msra.mxu1 %v85_v30  ;;  %v661_v3 = vld [vmem:[#allocation9] sm:$0x7]  ;;  %v260_v4 = vld [vmem:[#allocation7 + $0x258] sm:$0xff]  ;;  %v258_v8 = vld [vmem:[#allocation7 + $0x248] sm:$0xff] }
  0x31   :  { %177 = vmatpush.msra.mxu2 %v92_v37  ;;  %293 = vmatpush.msra.mxu3 %v269_v58  ;;  %v261_v5 = vld [vmem:[#allocation7 + $0x260] sm:$0xff]  ;;  %v259_v9 = vld [vmem:[#allocation7 + $0x250] sm:$0xff]  ;;  %v254_v10 = vld [vmem:[#allocation7 + $0x228] sm:$0xff]  ;;  %v122_v13 = vperm.slane %v661_v3, 0  ;;  %v123_v14 = vperm.slane %v661_v3, 1 }
  0x32   :  { %140 = vmatpush.msra.mxu0 %v81_v32  ;;  %160 = vmatpush.msra.mxu1 %v82_v33  ;;  %v257_v7 = vld [vmem:[#allocation7 + $0x240] sm:$0xff]  ;;  %v255_v11 = vld [vmem:[#allocation7 + $0x230] sm:$0xff]  ;;  %v256_v12 = vld [vmem:[#allocation7 + $0x238] sm:$0xff] }
  0x33   :  { %178 = vmatpush.msra.mxu2 %v89_v40  ;;  %294 = vmatpush.msra.mxu3 %v266_v61  ;;  %v251_v15 = vld [vmem:[#allocation7 + $0x210] sm:$0xff]  ;;  %v252_v16 = vld [vmem:[#allocation7 + $0x218] sm:$0xff]  ;;  %v253_v17 = vld [vmem:[#allocation7 + $0x220] sm:$0xff] }
  0x34   :  { %141 = vmatpush.msra.mxu0 %v78_v35  ;;  %161 = vmatpush.msra.mxu1 %v79_v36  ;;  %v248_v22 = vld [vmem:[#allocation7 + $0x1f8] sm:$0xff]  ;;  %v249_v23 = vld [vmem:[#allocation7 + $0x200] sm:$0xff]  ;;  %v250_v24 = vld [vmem:[#allocation7 + $0x208] sm:$0xff] }
  0x35   :  { %179 = vmatpush.msra.mxu2 %v86_v44  ;;  %295 = vmatpush.msra.mxu3 %v263_v0  ;;  %v245_v27 = vld [vmem:[#allocation7 + $0x1e0] sm:$0xff]  ;;  %v246_v28 = vld [vmem:[#allocation7 + $0x1e8] sm:$0xff]  ;;  %v247_v29 = vld [vmem:[#allocation7 + $0x1f0] sm:$0xff] }
  0x36   :  { %142 = vmatpush.msra.mxu0 %v75_v38  ;;  %162 = vmatpush.msra.mxu1 %v76_v39  ;;  %v242_v30 = vld [vmem:[#allocation7 + $0x1c8] sm:$0xff]  ;;  %v243_v31 = vld [vmem:[#allocation7 + $0x1d0] sm:$0xff]  ;;  %v244_v32 = vld [vmem:[#allocation7 + $0x1d8] sm:$0xff] }
  0x37   :  { %180 = vmatpush.msra.mxu2 %v83_v45  ;;  %296 = vmatpush.msra.mxu3 %v260_v4  ;;  %v239_v33 = vld [vmem:[#allocation7 + $0x1b0] sm:$0xff]  ;;  %v240_v34 = vld [vmem:[#allocation7 + $0x1b8] sm:$0xff]  ;;  %v241_v35 = vld [vmem:[#allocation7 + $0x1c0] sm:$0xff] }
  0x38   :  { %143 = vmatpush.msra.mxu0 %v72_v41  ;;  %163 = vmatpush.msra.mxu1 %v73_v42  ;;  %v236_v36 = vld [vmem:[#allocation7 + $0x198] sm:$0xff]  ;;  %v237_v37 = vld [vmem:[#allocation7 + $0x1a0] sm:$0xff]  ;;  %v238_v38 = vld [vmem:[#allocation7 + $0x1a8] sm:$0xff] }
  0x39   :  { %144 = vmatmul.f32.vlgmr.msra.gmra.mxu0 %v71_v43  ;;  %164 = vmatmul.f32.vlgmr.msra.gmra.mxu1 %v71_v43  ;;  %v233_v39 = vld [vmem:[#allocation7 + $0x180] sm:$0xff]  ;;  %v234_v40 = vld [vmem:[#allocation7 + $0x188] sm:$0xff]  ;;  %v235_v41 = vld [vmem:[#allocation7 + $0x190] sm:$0xff] }
  0x3a   :  { %181 = vmatpush.msra.mxu2 %v80_v46  ;;  %310 = vmatpush.msrb.mxu0 %v279_v50 }
  0x3b   :  { %330 = vmatpush.msrb.mxu1 %v280_v51  ;;  %297 = vmatpush.msra.mxu3 %v257_v7 }
  0x3c   :  { %182 = vmatpush.msra.mxu2 %v77_v47  ;;  %311 = vmatpush.msrb.mxu0 %v276_v53  ;;  %v124_v53 = vperm.slane %v661_v3, 2 }
  0x3d   :  { %331 = vmatpush.msrb.mxu1 %v277_v54  ;;  %298 = vmatpush.msra.mxu3 %v254_v10 }
  0x3e   :  { %183 = vmatpush.msra.mxu2 %v74_v48  ;;  %312 = vmatpush.msrb.mxu0 %v273_v56 }
  0x3f   :  { %184 = vmatmul.f32.vlgmr.msra.gmra.mxu2 %v71_v43  ;;  %332 = vmatpush.msrb.mxu1 %v274_v57 }
  0x40   :  { %313 = vmatpush.msrb.mxu0 %v270_v59  ;;  %299 = vmatpush.msra.mxu3 %v251_v15 }
  0x41   :  { %333 = vmatpush.msrb.mxu1 %v271_v60  ;;  %v226_v60 = vld [vmem:[%s688_s4] sm:$0x1] }
  0x42   :  { %314 = vmatpush.msrb.mxu0 %v267_v62  ;;  %300 = vmatpush.msra.mxu3 %v248_v22 }
  0x43   :  { %334 = vmatpush.msrb.mxu1 %v268_v63 }
  0x44   :  { %315 = vmatpush.msrb.mxu0 %v264_v1  ;;  %301 = vmatpush.msra.mxu3 %v245_v27 }
  0x45   :  { %335 = vmatpush.msrb.mxu1 %v265_v2 }
  0x46   :  { %316 = vmatpush.msrb.mxu0 %v261_v5  ;;  %302 = vmatpush.msra.mxu3 %v242_v30 }
  0x47   :  { %336 = vmatpush.msrb.mxu1 %v262_v6 }
  0x48   :  { %317 = vmatpush.msrb.mxu0 %v258_v8  ;;  %303 = vmatpush.msra.mxu3 %v239_v33 }
  0x49   :  { %337 = vmatpush.msrb.mxu1 %v259_v9 }
  0x4a   :  { %318 = vmatpush.msrb.mxu0 %v255_v11  ;;  %304 = vmatpush.msra.mxu3 %v236_v36  ;;  %v282_v11 = vld [vmem:[#allocation9 + $0x3] sm:$0x7] }
  0x4b   :  { %338 = vmatpush.msrb.mxu1 %v256_v12  ;;  %v285_v12 = vperm.slane %v282_v11, 1 }
  0x4c   :  { %319 = vmatpush.msrb.mxu0 %v252_v16  ;;  %305 = vmatpush.msra.mxu3 %v233_v39  ;;  %v284_v16 = vperm.slane %v282_v11, 0 }
  0x4d   :  { %339 = vmatpush.msrb.mxu1 %v253_v17 }
  0x4e   :  { %320 = vmatpush.msrb.mxu0 %v249_v23 }
  0x4f   :  { %340 = vmatpush.msrb.mxu1 %v250_v24 }
  0x50   :  { %321 = vmatpush.msrb.mxu0 %v246_v28 }
  0x51   :  { %341 = vmatpush.msrb.mxu1 %v247_v29 }
  0x52   :  { %322 = vmatpush.msrb.mxu0 %v243_v31 }
  0x53   :  { %342 = vmatpush.msrb.mxu1 %v244_v32 }
  0x54   :  { %323 = vmatpush.msrb.mxu0 %v240_v34  ;;  %v286_v34 = vperm.slane %v282_v11, 2 }
  0x55   :  { %343 = vmatpush.msrb.mxu1 %v241_v35 }
  0x56   :  { %324 = vmatpush.msrb.mxu0 %v237_v37 }
  0x57   :  { %344 = vmatpush.msrb.mxu1 %v238_v38  ;;  %v441_v38 = vld [vmem:[%s688_s4 + $0x1] sm:$0x1] }
  0x58   :  { %325 = vmatpush.msrb.mxu0 %v234_v40 }
  0x59   :  { %345 = vmatpush.msrb.mxu1 %v235_v41 }
  0xb6   :  { %v145_v18 = vpop.f32.mrf.mxu0  ;;  %v165_v19 = vpop.f32.mrf.mxu1 }
  0xb7   :  { %v146_v20 = vadd.f32 %v145_v18, %v122_v13  ;;  %v166_v21 = vadd.f32 %v165_v19, %v123_v14 }
  0xb9   :  { %v437_v25 = vmul.f32 -1.442695, %v146_v20  ;;  %v438_v26 = vmul.f32 -1.442695, %v166_v21 }
  0xbb   :  { %451 = vpow2.f32 %v437_v25 }
  0xbc   :  { %453 = vpow2.f32 %v438_v26 }
  0xc1   :  { %v452_v42 = vpop.eup %451 }
  0xc2   :  { %v454_v43 = vpop.eup %453  ;;  %v191_v44 = vadd.f32 1.0, %v452_v42  ;;  %v185_v57 = vpop.f32.mrf.mxu2 }
  0xc3   :  { %v210_v45 = vadd.f32 1.0, %v454_v43  ;;  %v186_v61 = vadd.f32 %v185_v57, %v124_v53 }
  0xc4   :  { %455 = vrcp.f32 %v191_v44  ;;  %v203_v52 = vand.u32 2147483648, %v191_v44  ;;  %v201_v55 = vand.u32 2147483647, %v191_v44  ;;  %vm197_vm1 = vweird.f32 %v191_v44 }
  0xc5   :  { %457 = vrcp.f32 %v210_v45  ;;  %vm216_vm4 = vweird.f32 %v210_v45  ;;  %v222_v2 = vand.u32 2147483648, %v210_v45  ;;  %v220_v3 = vand.u32 2147483647, %v210_v45 }
  0xc6   :  { %v204_v59 = vor.u32 1.1754944e-38, %v203_v52  ;;  %vm202_vm3 = vcmp.eq.f32.partialorder %v201_v55, 8.507059e+37 }
  0xc7   :  { %v223_v6 = vor.u32 1.1754944e-38, %v222_v2  ;;  %vm221_vm7 = vcmp.eq.f32.partialorder %v220_v3, 8.507059e+37 }
  0xca   :  { %v456_v46 = vpop.eup %455 }
  0xcb   :  { %v458_v47 = vpop.eup %457  ;;  %v193_v48 = vmul.f32 %v456_v46, %v191_v44  ;;  %vm198_vm0 = vweird.f32 %v456_v46 }
  0xcc   :  { %v212_v49 = vmul.f32 %v458_v47, %v210_v45  ;;  %vm199_vm2 = vmor %vm197_vm1, %vm198_vm0  ;;  %vm217_vm5 = vweird.f32 %v458_v47  ;;  %vm398_vm0 = vcmask 1040384  }
  0xcd   :  { %v194_v50 = vsub.f32 1.0, %v193_v48  ;;  %vm218_vm6 = vmor %vm216_vm4, %vm217_vm5 }
  0xce   :  { %v213_v51 = vsub.f32 1.0, %v212_v49 }
  0xcf   :  { %v195_v54 = vmul.f32 %v456_v46, %v194_v50 }
  0xd0   :  { %v214_v56 = vmul.f32 %v458_v47, %v213_v51 }
  0xd1   :  { %v196_v58 = vadd.f32 %v456_v46, %v195_v54 }
  0xd2   :  { %v215_v0 = vadd.f32 %v458_v47, %v214_v56 }
  0xd3   :  { %v200_v62 = vsel %vm199_vm2, %v456_v46, %v196_v58 }
  0xd4   :  { %v205_v63 = vsel %vm202_vm3, %v204_v59, %v200_v62  ;;  %v219_v5 = vsel %vm218_vm6, %v458_v47, %v215_v0 }
  0xd5   :  { %v227_v1 = vmul.f32 %v226_v60, %v205_v63  ;;  %v224_v7 = vsel %vm221_vm7, %v223_v6, %v219_v5 }
  0xd6   :  { %v230_v8 = vsub.f32 1.0, %v224_v7 }
  0xd7   :  { %v228_v4 = vadd.f32 %v227_v1, %v186_v61 }
  0xd9   :  { %459 = vtanh.f32 %v228_v4 }
  0xdf   :  { %v460_v9 = vpop.eup %459 }
  0xe0   :  { %v669_v10 = vmul.f32 %v460_v9, %v230_v8 }
  0xe2   :  { %306 = vmatmul.f32.vlgmr.msra.gmra.mxu3 %v669_v10  ;;  %326 = vmatmul.f32.vlgmr.msrb.gmra.mxu0 %v669_v10 }
  0xe3   :  { %346 = vmatmul.f32.vlgmr.msrb.gmra.mxu1 %v669_v10 }
 0x15f   :  { %v327_v13 = vpop.f32.mrf.mxu0 }
 0x160   :  { %v328_v14 = vadd.f32 %v327_v13, %v285_v12  ;;  %v347_v36 = vpop.f32.mrf.mxu1 }
 0x161   :  { %v348_v42 = vadd.f32 %v347_v36, %v286_v34 }
 0x162   :  { %v440_v15 = vmul.f32 -1.442695, %v328_v14 }
 0x164   :  { %461 = vpow2.f32 %v440_v15 }
 0x165   :  { %v307_v17 = vpop.f32.mrf.mxu3 }
 0x166   :  { %v308_v18 = vadd.f32 %v307_v17, %v284_v16 }
 0x168   :  { %v439_v19 = vmul.f32 -1.442695, %v308_v18 }
 0x16a   :  { %v462_v20 = vpop.eup %461  ;;  %463 = vpow2.f32 %v439_v19 }
 0x16b   :  { %v372_v21 = vadd.f32 1.0, %v462_v20 }
 0x16d   :  { %465 = vrcp.f32 %v372_v21  ;;  %v384_v43 = vand.u32 2147483648, %v372_v21  ;;  %vm378_vm13 = vweird.f32 %v372_v21  ;;  %v382_v45 = vand.u32 2147483647, %v372_v21 }
 0x16f   :  { %v385_v48 = vor.u32 1.1754944e-38, %v384_v43  ;;  %vm383_vm15 = vcmp.eq.f32.partialorder %v382_v45, 8.507059e+37 }
 0x170   :  { %v464_v22 = vpop.eup %463 }
 0x171   :  { %v353_v23 = vadd.f32 1.0, %v464_v22 }
 0x173   :  { %467 = vrcp.f32 %v353_v23  ;;  %v466_v24 = vpop.eup %465  ;;  %v365_v30 = vand.u32 2147483648, %v353_v23  ;;  %v363_v32 = vand.u32 2147483647, %v353_v23  ;;  %vm359_vm9 = vweird.f32 %v353_v23 }
 0x174   :  { %v374_v25 = vmul.f32 %v466_v24, %v372_v21  ;;  %vm379_vm12 = vweird.f32 %v466_v24 }
 0x175   :  { %v366_v37 = vor.u32 1.1754944e-38, %v365_v30  ;;  %vm364_vm11 = vcmp.eq.f32.partialorder %v363_v32, 8.507059e+37  ;;  %vm380_vm14 = vmor %vm378_vm13, %vm379_vm12 }
 0x176   :  { %v375_v28 = vsub.f32 1.0, %v374_v25 }
 0x178   :  { %v376_v33 = vmul.f32 %v466_v24, %v375_v28 }
 0x179   :  { %v468_v26 = vpop.eup %467 }
 0x17a   :  { %v355_v27 = vmul.f32 %v468_v26, %v353_v23  ;;  %vm360_vm8 = vweird.f32 %v468_v26  ;;  %v377_v41 = vadd.f32 %v466_v24, %v376_v33 }
 0x17b   :  { %vm361_vm10 = vmor %vm359_vm9, %vm360_vm8 }
 0x17c   :  { %v356_v29 = vsub.f32 1.0, %v355_v27  ;;  %v381_v47 = vsel %vm380_vm14, %v466_v24, %v377_v41 }
 0x17d   :  { %v386_v49 = vsel %vm383_vm15, %v385_v48, %v381_v47 }
 0x17e   :  { %v357_v31 = vmul.f32 %v468_v26, %v356_v29  ;;  %v393_v50 = vsub.f32 1.0, %v386_v49 }
 0x180   :  { %v358_v35 = vadd.f32 %v468_v26, %v357_v31 }
 0x182   :  { %v362_v39 = vsel %vm361_vm10, %v468_v26, %v358_v35 }
 0x183   :  { %v367_v40 = vsel %vm364_vm11, %v366_v37, %v362_v39 }
 0x184   :  { %v390_v44 = vmul.f32 %v441_v38, %v367_v40 }
 0x186   :  { %v391_v46 = vadd.f32 %v390_v44, %v348_v42 }
 0x188   :  { %469 = vtanh.f32 %v391_v46 }
 0x18e   :  { %v470_v51 = vpop.eup %469 }
 0x18f   :  { %v394_v52 = vmul.f32 %v470_v51, %v393_v50 }
 0x191   :  { %v396_v53 = vrot.slane %v394_v52, 7  ;;  %401 = vst [vmem:[#allocation10] sm:$0x1] %v394_v52 }
 0x192   :  { %412 = dma.vmem_to_hbm [thread:$0]  %s408_s27, 16, %s410_s29, [#allocation6]  }
 0x193   :  { %v399_v54 = vsel %vm398_vm0, %v669_v10, %v396_v53 }
 0x194   :  { %400 = vst [vmem:[#allocation11] sm:$0x3] %v399_v54 }
 0x195   :  { %423 = dma.vmem_to_hbm [thread:$0]  %s419_s7, 32, %s421_s10, [#allocation12]  }
 0x196   :  { %595 = dma.done.wait [#allocation6], 16  }
 0x197   :  { %596 = vsyncadd [#allocation6], 4294967280 }
 0x198   :  { %597 = dma.done.wait [#allocation12], 32  }
 0x199   :  { %598 = vsyncadd [#allocation12], 4294967264 }
 0x19a   :  { %432 = vsyncpa [#allocation5], 1 }
 0x19b   :  { %433 = vsyncpa [#allocation8], 1 }
 0x19c   :  { %434 = vsyncpa [#allocation6], 1 }
 0x19d   :  { %435 = vsyncpa [#allocation12], 1 }

</bundles_post_ra>
